<compile_context>
chip_gen: v7x
topology: tpu7x:2x2x1
jax: 0.10.0
libtpu: 0.0.40
codegen_flags: <defaults>
</compile_context>

<pallas_src>
import functools

import numpy as np
import jax
import jax.numpy as jnp
from jax.experimental import pallas as pl
from jax.experimental.pallas import tpu as pltpu


def gating_attention_kernel(x_ref, kt_ref, v_ref, bias_ref, mask_ref,
                            wq_ref, wg_ref, bg_ref, wo_ref, bo_ref,
                            o_ref, acc_ref, *, has_bias, has_mask):
    h = pl.program_id(2)

    x_q = x_ref[0]                           # (TQ, C)  query tile, model dtype
    k_h = kt_ref[0, 0]                       # (hd, L)  K pre-transposed, L on lanes
    v_h = v_ref[0, 0]                        # (L, hd)

    # Per-head Q projection (softmax scale folded into wq in the wrapper).
    q_h = jnp.dot(x_q, wq_ref[0],
                  preferred_element_type=jnp.float32).astype(x_q.dtype)   # (TQ, hd)

    # Scores: canonical (TQ, hd) x (hd, L) matmul, lane-dense (TQ, L) result.
    s = jnp.dot(q_h, k_h, preferred_element_type=jnp.float32)
    if has_bias:
        s = s + bias_ref[0, 0].astype(jnp.float32)
    if has_mask:
        s = s + mask_ref[0]                  # additive (1, L) row of 0 / -1e30

    # Softmax in f32; normalization deferred until after the PV matmul so the
    # divide acts on (TQ, hd) instead of (TQ, L) and can be exact for free.
    s_max = jnp.max(s, axis=-1, keepdims=True)
    p = jnp.exp(s - s_max)
    denom = jnp.sum(p, axis=-1, keepdims=True)

    y_h = jnp.dot(p.astype(v_h.dtype), v_h,
                  preferred_element_type=jnp.float32)                      # (TQ, hd)
    y_h = y_h * (1.0 / denom)

    # Gating for this head's channel slab.
    g_h = jnp.dot(x_q, wg_ref[0],
                  preferred_element_type=jnp.float32) + bg_ref[0]          # (TQ, hd)
    yg = (jax.nn.sigmoid(g_h) * y_h).astype(x_q.dtype)

    # Per-head slice of the output projection; accumulate full (TQ, C) width so
    # every store is lane-dense (no masked head_dim-wide writes).
    contrib = jnp.dot(yg, wo_ref[0], preferred_element_type=jnp.float32)   # (TQ, C)

    @pl.when(h == 0)
    def _():
        acc_ref[...] = contrib

    @pl.when(h != 0)
    def _():
        acc_ref[...] = acc_ref[...] + contrib

    @pl.when(h == pl.num_programs(2) - 1)
    def _():
        o_ref[0] = (acc_ref[...] + bo_ref[...]).astype(o_ref.dtype)


def _round_up(n, m):
    return (n + m - 1) // m * m


def _vmem_capacity_bytes():
    try:
        cap = int(getattr(pltpu.get_tpu_info(), "vmem_capacity_bytes", 0))
    except Exception:
        cap = 0
    return cap or (64 << 20)            # conservative fallback (v7x per-TC VMEM)


_TQ_CANDIDATES = (512, 256, 128, 64, 32, 16, 8)


def _pick_q_tile(L_q, L_k, C, head_dim, has_bias, has_mask, itemsize, vmem_cap):
    """Largest q-tile whose per-grid-step VMEM footprint fits the chip budget."""
    budget = int(vmem_cap * 0.55)
    # TQ-independent footprint (double-buffered per-head streams + weights).
    fixed = 2 * 2 * head_dim * L_k * itemsize                     # K^T + V blocks
    fixed += 2 * (3 * C * head_dim * itemsize + head_dim * 4 + C * 4)
    if has_mask:
        fixed += 2 * L_k * 4
    fixed += 2 << 20                                              # compiler slack
    tq = _TQ_CANDIDATES[-1]
    for cand in _TQ_CANDIDATES:
        per = 2 * 2 * cand * C * itemsize                         # x + out tiles
        per += cand * C * 4                                       # f32 accumulator
        per += 2 * cand * L_k * 4                                 # f32 score temps
        if has_bias:
            per += 2 * cand * L_k * itemsize                      # bias tile
        if fixed + per <= budget:
            tq = cand
            break
    if _round_up(L_q, 8) <= tq:
        return _round_up(L_q, 8)                                  # single tile
    # Keep q-padding waste below half a tile.
    while tq > 128 and _round_up(L_q, tq) - L_q > tq // 2:
        tq //= 2
    return tq


def gating_attention(x, params, num_heads, mask=None, bias=None):
    w_qkv, w_g, b_g, w_o, b_o = params
    B, L, C = x.shape
    assert C % num_heads == 0
    hd = C // num_heads
    scale = hd ** (-0.5)
    itx = jnp.dtype(x.dtype).itemsize
    has_bias = bias is not None
    has_mask = mask is not None

    vmem_cap = _vmem_capacity_bytes()
    tq = _pick_q_tile(L, L, C, hd, has_bias, has_mask, itx, vmem_cap)
    L_pad = _round_up(L, tq)
    n_qt = L_pad // tq

    # --- one-time parameter reordering (PyTorch interleaved q|k|v columns) ---
    w3 = w_qkv.reshape(C, num_heads, 3, hd)
    wq_h = jnp.transpose(w3[:, :, 0, :] * scale, (1, 0, 2)).astype(x.dtype)  # (H,C,hd)
    w_k = w3[:, :, 1, :].reshape(C, C).astype(x.dtype)
    w_v = w3[:, :, 2, :].reshape(C, C).astype(x.dtype)
    wg_h = jnp.transpose(w_g.reshape(C, num_heads, hd), (1, 0, 2)).astype(x.dtype)
    bg_h = b_g.reshape(num_heads, 1, hd).astype(jnp.float32)                 # (H,1,hd)
    wo_h = w_o.reshape(num_heads, hd, C).astype(x.dtype)                     # (H,hd,C)
    bo2 = b_o.reshape(1, C).astype(jnp.float32)

    # --- K / V projection hoisted out of the kernel; K stored transposed ---
    k = jnp.dot(x, w_k).reshape(B, L, num_heads, hd)
    kt = jnp.transpose(k, (0, 2, 3, 1)).astype(x.dtype)                      # (B,H,hd,L)
    v = jnp.transpose(jnp.dot(x, w_v).reshape(B, L, num_heads, hd),
                      (0, 2, 1, 3)).astype(x.dtype)                          # (B,H,L,hd)

    # Queries / bias padded along Lq only (keys are never padded).
    x_pad = jnp.pad(x, ((0, 0), (0, L_pad - L), (0, 0))) if L_pad != L else x

    if has_mask:
        mask_add = jnp.where(mask.reshape(B, 1, L), 0.0, -1e30).astype(jnp.float32)
        mask_spec = pl.BlockSpec((1, 1, L), lambda b, qi, h: (b, 0, 0))
    else:
        mask_add = jnp.zeros((1, 1, 1), jnp.float32)                         # dummy
        mask_spec = pl.BlockSpec((1, 1, 1), lambda b, qi, h: (0, 0, 0))

    if has_bias:
        bias_t = jnp.transpose(bias, (0, 3, 1, 2)).astype(x.dtype)           # (B,H,Lq,Lk)
        if L_pad != L:
            bias_t = jnp.pad(bias_t, ((0, 0), (0, 0), (0, L_pad - L), (0, 0)))
        bias_spec = pl.BlockSpec((1, 1, tq, L), lambda b, qi, h: (b, h, qi, 0))
    else:
        bias_t = jnp.zeros((1, 1, 1, 1), x.dtype)                            # dummy
        bias_spec = pl.BlockSpec((1, 1, 1, 1), lambda b, qi, h: (0, 0, 0, 0))

    # Scoped-VMEM limit from the actual blocks + headroom, clamped to the
    # detected per-generation capacity (no hard-coded 64 MiB cap).
    blk = 2 * 2 * tq * C * itx                      # x + out tiles (double-buffered)
    blk += 2 * 2 * hd * L * itx                     # K^T + V per-head blocks
    blk += 2 * tq * L * itx if has_bias else 128
    blk += 2 * L * 4 if has_mask else 128
    wbytes = 2 * (3 * C * hd * itx + hd * 4 + C * 4)
    work = tq * C * 4 + 2 * tq * L * 4              # accumulator + f32 score temps
    vmem_limit = int(min(max(blk + wbytes + work + (4 << 20), 32 << 20), vmem_cap))

    # NOTE: the weight / mask blocks have constant index maps; once buffer_count=1
    # (pl.Buffered(1)) is known-good in the target JAX they can be single-buffered.
    in_specs = [
        pl.BlockSpec((1, tq, C), lambda b, qi, h: (b, qi, 0)),        # x query tile
        pl.BlockSpec((1, 1, hd, L), lambda b, qi, h: (b, h, 0, 0)),   # K^T per head
        pl.BlockSpec((1, 1, L, hd), lambda b, qi, h: (b, h, 0, 0)),   # V per head
        bias_spec,                                                    # bias tile
        mask_spec,                                                    # additive mask
        pl.BlockSpec((1, C, hd), lambda b, qi, h: (h, 0, 0)),         # w_q (scaled)
        pl.BlockSpec((1, C, hd), lambda b, qi, h: (h, 0, 0)),         # w_g
        pl.BlockSpec((1, 1, hd), lambda b, qi, h: (h, 0, 0)),         # b_g
        pl.BlockSpec((1, hd, C), lambda b, qi, h: (h, 0, 0)),         # w_o
        pl.BlockSpec((1, C), lambda b, qi, h: (0, 0)),                # b_o
    ]
    out_specs = pl.BlockSpec((1, tq, C), lambda b, qi, h: (b, qi, 0))

    kernel = functools.partial(gating_attention_kernel,
                               has_bias=has_bias, has_mask=has_mask)

    out = pl.pallas_call(
        kernel,
        out_shape=jax.ShapeDtypeStruct((B, L_pad, C), x.dtype),
        grid=(B, n_qt, num_heads),
        in_specs=in_specs,
        out_specs=out_specs,
        scratch_shapes=[pltpu.VMEM((tq, C), jnp.float32)],            # output acc
        compiler_params=pltpu.CompilerParams(
            dimension_semantics=("parallel", "parallel", "arbitrary"),
            vmem_limit_bytes=vmem_limit),
    )(x_pad, kt, v, bias_t, mask_add, wq_h, wg_h, bg_h, wo_h, bo2)

    return out[:, :L, :] if L_pad != L else out


def gating_attention_reference(x, params, num_heads, mask=None, bias=None):
    """Pure-JAX reference mirroring the PyTorch forward exactly."""
    w_qkv, w_g, b_g, w_o, b_o = params
    B, L, C = x.shape
    hd = C // num_heads
    qkv = x @ w_qkv                                                  # (B, L, 3C)
    t = qkv.reshape(B, L, num_heads, 3 * hd).transpose(0, 2, 1, 3)   # (B,H,L,3hd)
    q, k, v = t[..., :hd], t[..., hd:2 * hd], t[..., 2 * hd:]
    q = q * hd ** (-0.5)
    s = jnp.einsum('bhqc,bhkc->bhqk', q, k)
    if bias is not None:
        s = s + jnp.transpose(bias, (0, 3, 1, 2))
    if mask is not None:
        s = jnp.where(mask[:, None, None, :], s, -jnp.inf)
    p = jax.nn.softmax(s.astype(jnp.float32), axis=-1).astype(q.dtype)
    y = jnp.einsum('bhqk,bhkc->bqhc', p, v).reshape(B, L, C)
    g = jax.nn.sigmoid(x @ w_g + b_g)
    y = g * y
    return y @ w_o + b_o


if __name__ == "__main__":
    B, L, dim, num_heads = 2, 8, 32, 4

    key = jax.random.PRNGKey(0)
    kx, kb, kw1, kw2, kb2, kw3, kb3 = jax.random.split(key, 7)

    x = jax.random.normal(kx, (B, L, dim), dtype=jnp.float32)

    # deterministic synthetic parameters (Linear weights stored as (in, out),
    # QKV columns in the PyTorch per-head interleaved (q_h|k_h|v_h) order)
    w_qkv = jax.random.normal(kw1, (dim, 3 * dim), dtype=jnp.float32) * 0.1
    w_g = jax.random.normal(kw2, (dim, dim), dtype=jnp.float32) * 0.1
    b_g = jax.random.normal(kb2, (dim,), dtype=jnp.float32) * 0.1
    w_o = jax.random.normal(kw3, (dim, dim), dtype=jnp.float32) * 0.1
    b_o = jax.random.normal(kb3, (dim,), dtype=jnp.float32) * 0.1
    params = (w_qkv, w_g, b_g, w_o, b_o)

    # pairwise bias (B, Lq, Lk, H) and key mask (B, Lk) with last 2 keys padded
    bias = jax.random.normal(kb, (B, L, L, num_heads), dtype=jnp.float32) * 0.5
    mask = jnp.concatenate(
        [jnp.ones((B, L - 2), dtype=bool), jnp.zeros((B, 2), dtype=bool)],
        axis=-1)

    # mask + bias
    out = gating_attention(x, params, num_heads, mask=mask, bias=bias)
    out = jax.block_until_ready(out)
    ref = gating_attention_reference(x, params, num_heads, mask=mask, bias=bias)
    np.testing.assert_allclose(np.asarray(out), np.asarray(ref),
                               rtol=2e-3, atol=2e-3)

    # mask only (exercises the bias-free spec with a real mask)
    out_m = gating_attention(x, params, num_heads, mask=mask)
    out_m = jax.block_until_ready(out_m)
    ref_m = gating_attention_reference(x, params, num_heads, mask=mask)
    np.testing.assert_allclose(np.asarray(out_m), np.asarray(ref_m),
                               rtol=2e-3, atol=2e-3)

    # neither mask nor bias
    out2 = gating_attention(x, params, num_heads)
    out2 = jax.block_until_ready(out2)
    ref2 = gating_attention_reference(x, params, num_heads)
    np.testing.assert_allclose(np.asarray(out2), np.asarray(ref2),
                               rtol=2e-3, atol=2e-3)

    print("KERNEL_OK")
</pallas_src>

<mosaic_0001>
module attributes {stable_mosaic.version = 11 : i64} {
  func.func @gating_attention_kernel(%arg0: i32, %arg1: i32, %arg2: i32, %arg3: memref<1x8x32xf32, #tpu.memory_space<vmem>>, %arg4: memref<1x1x8x8xf32, #tpu.memory_space<vmem>>, %arg5: memref<1x1x8x8xf32, #tpu.memory_space<vmem>>, %arg6: memref<1x1x8x8xf32, #tpu.memory_space<vmem>>, %arg7: memref<1x1x8xf32, #tpu.memory_space<vmem>>, %arg8: memref<1x32x8xf32, #tpu.memory_space<vmem>>, %arg9: memref<1x32x8xf32, #tpu.memory_space<vmem>>, %arg10: memref<1x1x8xf32, #tpu.memory_space<vmem>>, %arg11: memref<1x8x32xf32, #tpu.memory_space<vmem>>, %arg12: memref<1x32xf32, #tpu.memory_space<vmem>>, %arg13: memref<1x8x32xf32, #tpu.memory_space<vmem>>, %arg14: memref<8x32xf32, #tpu.memory_space<vmem>>) attributes {dimension_semantics = [#tpu.dimension_semantics<parallel>, #tpu.dimension_semantics<parallel>, #tpu.dimension_semantics<arbitrary>], iteration_bounds = array<i64: 2, 1, 4>, scalar_prefetch = 0 : i64, scratch_operands = 1 : i64, tpu.core_type = #tpu.core_type<tc>, window_params = [{transform_indices = @transform_0, window_bounds = array<i64: 1, 8, 32>}, {transform_indices = @transform_1, window_bounds = array<i64: 1, 1, 8, 8>}, {transform_indices = @transform_2, window_bounds = array<i64: 1, 1, 8, 8>}, {transform_indices = @transform_3, window_bounds = array<i64: 1, 1, 8, 8>}, {transform_indices = @transform_4, window_bounds = array<i64: 1, 1, 8>}, {transform_indices = @transform_5, window_bounds = array<i64: 1, 32, 8>}, {transform_indices = @transform_6, window_bounds = array<i64: 1, 32, 8>}, {transform_indices = @transform_7, window_bounds = array<i64: 1, 1, 8>}, {transform_indices = @transform_8, window_bounds = array<i64: 1, 8, 32>}, {pipeline_mode = #tpu.pipeline_mode<synchronous>, transform_indices = @transform_9, window_bounds = array<i64: 1, 32>}, {transform_indices = @transform_10, window_bounds = array<i64: 1, 8, 32>}]} {
    %c0 = arith.constant 0 : index
    %c0_0 = arith.constant 0 : index
    %c0_1 = arith.constant 0 : index
    %0 = vector.load %arg3[%c0, %c0_0, %c0_1] : memref<1x8x32xf32, #tpu.memory_space<vmem>>, vector<1x8x32xf32>
    %1 = vector.shape_cast %0 : vector<1x8x32xf32> to vector<8x32xf32>
    %c0_2 = arith.constant 0 : index
    %c0_3 = arith.constant 0 : index
    %c0_4 = arith.constant 0 : index
    %c0_5 = arith.constant 0 : index
    %2 = vector.load %arg4[%c0_2, %c0_3, %c0_4, %c0_5] : memref<1x1x8x8xf32, #tpu.memory_space<vmem>>, vector<1x1x8x8xf32>
    %3 = vector.shape_cast %2 : vector<1x1x8x8xf32> to vector<8x8xf32>
    %c0_6 = arith.constant 0 : index
    %c0_7 = arith.constant 0 : index
    %c0_8 = arith.constant 0 : index
    %c0_9 = arith.constant 0 : index
    %4 = vector.load %arg5[%c0_6, %c0_7, %c0_8, %c0_9] : memref<1x1x8x8xf32, #tpu.memory_space<vmem>>, vector<1x1x8x8xf32>
    %5 = vector.shape_cast %4 : vector<1x1x8x8xf32> to vector<8x8xf32>
    %c0_10 = arith.constant 0 : index
    %c0_11 = arith.constant 0 : index
    %c0_12 = arith.constant 0 : index
    %6 = vector.load %arg8[%c0_10, %c0_11, %c0_12] : memref<1x32x8xf32, #tpu.memory_space<vmem>>, vector<1x32x8xf32>
    %7 = vector.shape_cast %6 : vector<1x32x8xf32> to vector<32x8xf32>
    %cst = arith.constant dense<0.000000e+00> : vector<8x8xf32>
    %8 = tpu.matmul %1, %7, %cst {dimension_numbers = #tpu.dot_dimension_numbers<[1], [0], [0], [1], [0, 0, 1, 1], [], []>} : vector<8x32xf32>, vector<32x8xf32>, vector<8x8xf32> -> vector<8x8xf32>
    %cst_13 = arith.constant dense<0.000000e+00> : vector<8x8xf32>
    %9 = tpu.matmul %8, %3, %cst_13 {dimension_numbers = #tpu.dot_dimension_numbers<[1], [0], [0], [1], [0, 0, 1, 1], [], []>} : vector<8x8xf32>, vector<8x8xf32>, vector<8x8xf32> -> vector<8x8xf32>
    %c0_14 = arith.constant 0 : index
    %c0_15 = arith.constant 0 : index
    %c0_16 = arith.constant 0 : index
    %c0_17 = arith.constant 0 : index
    %10 = vector.load %arg6[%c0_14, %c0_15, %c0_16, %c0_17] : memref<1x1x8x8xf32, #tpu.memory_space<vmem>>, vector<1x1x8x8xf32>
    %11 = vector.shape_cast %10 : vector<1x1x8x8xf32> to vector<8x8xf32>
    %12 = arith.addf %9, %11 : vector<8x8xf32>
    %c0_18 = arith.constant 0 : index
    %c0_19 = arith.constant 0 : index
    %c0_20 = arith.constant 0 : index
    %13 = vector.load %arg7[%c0_18, %c0_19, %c0_20] : memref<1x1x8xf32, #tpu.memory_space<vmem>>, vector<1x1x8xf32>
    %14 = vector.shape_cast %13 : vector<1x1x8xf32> to vector<1x8xf32>
    %15 = vector.broadcast %14 : vector<1x8xf32> to vector<8x8xf32>
    %16 = arith.addf %12, %15 : vector<8x8xf32>
    %cst_21 = arith.constant dense<0xFF800000> : vector<8xf32>
    %17 = vector.multi_reduction <maximumf>, %16, %cst_21 [1] : vector<8x8xf32> to vector<8xf32>
    %18 = vector.shape_cast %17 : vector<8xf32> to vector<8x1xf32>
    %19 = vector.broadcast %18 : vector<8x1xf32> to vector<8x8xf32>
    %20 = arith.subf %16, %19 : vector<8x8xf32>
    %21 = math.exp %20 : vector<8x8xf32>
    %cst_22 = arith.constant dense<0.000000e+00> : vector<8xf32>
    %22 = vector.multi_reduction <add>, %21, %cst_22 [1] : vector<8x8xf32> to vector<8xf32>
    %23 = vector.shape_cast %22 : vector<8xf32> to vector<8x1xf32>
    %cst_23 = arith.constant dense<0.000000e+00> : vector<8x8xf32>
    %24 = tpu.matmul %21, %5, %cst_23 {dimension_numbers = #tpu.dot_dimension_numbers<[1], [0], [0], [1], [0, 0, 1, 1], [], []>} : vector<8x8xf32>, vector<8x8xf32>, vector<8x8xf32> -> vector<8x8xf32>
    %cst_24 = arith.constant 1.000000e+00 : f32
    %25 = vector.broadcast %cst_24 : f32 to vector<8x1xf32>
    %26 = arith.divf %25, %23 : vector<8x1xf32>
    %27 = vector.broadcast %26 : vector<8x1xf32> to vector<8x8xf32>
    %28 = arith.mulf %24, %27 : vector<8x8xf32>
    %c0_25 = arith.constant 0 : index
    %c0_26 = arith.constant 0 : index
    %c0_27 = arith.constant 0 : index
    %29 = vector.load %arg9[%c0_25, %c0_26, %c0_27] : memref<1x32x8xf32, #tpu.memory_space<vmem>>, vector<1x32x8xf32>
    %30 = vector.shape_cast %29 : vector<1x32x8xf32> to vector<32x8xf32>
    %cst_28 = arith.constant dense<0.000000e+00> : vector<8x8xf32>
    %31 = tpu.matmul %1, %30, %cst_28 {dimension_numbers = #tpu.dot_dimension_numbers<[1], [0], [0], [1], [0, 0, 1, 1], [], []>} : vector<8x32xf32>, vector<32x8xf32>, vector<8x8xf32> -> vector<8x8xf32>
    %c0_29 = arith.constant 0 : index
    %c0_30 = arith.constant 0 : index
    %c0_31 = arith.constant 0 : index
    %32 = vector.load %arg10[%c0_29, %c0_30, %c0_31] : memref<1x1x8xf32, #tpu.memory_space<vmem>>, vector<1x1x8xf32>
    %33 = vector.shape_cast %32 : vector<1x1x8xf32> to vector<1x8xf32>
    %34 = vector.broadcast %33 : vector<1x8xf32> to vector<8x8xf32>
    %35 = arith.addf %31, %34 : vector<8x8xf32>
    %36 = arith.negf %35 : vector<8x8xf32>
    %37 = math.exp %36 : vector<8x8xf32>
    %cst_32 = arith.constant 1.000000e+00 : f32
    %38 = vector.broadcast %cst_32 : f32 to vector<8x8xf32>
    %39 = arith.addf %38, %37 : vector<8x8xf32>
    %40 = arith.divf %38, %39 : vector<8x8xf32>
    %41 = arith.mulf %40, %28 : vector<8x8xf32>
    %c0_33 = arith.constant 0 : index
    %c0_34 = arith.constant 0 : index
    %c0_35 = arith.constant 0 : index
    %42 = vector.load %arg11[%c0_33, %c0_34, %c0_35] : memref<1x8x32xf32, #tpu.memory_space<vmem>>, vector<1x8x32xf32>
    %43 = vector.shape_cast %42 : vector<1x8x32xf32> to vector<8x32xf32>
    %cst_36 = arith.constant dense<0.000000e+00> : vector<8x32xf32>
    %44 = tpu.matmul %41, %43, %cst_36 {dimension_numbers = #tpu.dot_dimension_numbers<[1], [0], [0], [1], [0, 0, 1, 1], [], []>} : vector<8x8xf32>, vector<8x32xf32>, vector<8x32xf32> -> vector<8x32xf32>
    %c0_i32 = arith.constant 0 : i32
    %45 = arith.cmpi eq, %arg2, %c0_i32 : i32
    %46 = arith.extui %45 : i1 to i32
    %c0_i32_37 = arith.constant 0 : i32
    %47 = arith.cmpi ne, %46, %c0_i32_37 : i32
    scf.if %47 {
      %c0_41 = arith.constant 0 : index
      %c0_42 = arith.constant 0 : index
      %54 = vector.load %arg14[%c0_41, %c0_42] : memref<8x32xf32, #tpu.memory_space<vmem>>, vector<8x32xf32>
      tpu.vector_store %arg14[%c0_41, %c0_42], %44 {strides = array<i32>} : memref<8x32xf32, #tpu.memory_space<vmem>>, vector<8x32xf32>,
    } else {
    }
    %c0_i32_38 = arith.constant 0 : i32
    %48 = arith.cmpi ne, %arg2, %c0_i32_38 : i32
    %49 = arith.extui %48 : i1 to i32
    %c0_i32_39 = arith.constant 0 : i32
    %50 = arith.cmpi ne, %49, %c0_i32_39 : i32
    scf.if %50 {
      %c0_41 = arith.constant 0 : index
      %c0_42 = arith.constant 0 : index
      %54 = vector.load %arg14[%c0_41, %c0_42] : memref<8x32xf32, #tpu.memory_space<vmem>>, vector<8x32xf32>
      %55 = arith.addf %54, %44 : vector<8x32xf32>
      %c0_43 = arith.constant 0 : index
      %c0_44 = arith.constant 0 : index
      %56 = vector.load %arg14[%c0_43, %c0_44] : memref<8x32xf32, #tpu.memory_space<vmem>>, vector<8x32xf32>
      tpu.vector_store %arg14[%c0_43, %c0_44], %55 {strides = array<i32>} : memref<8x32xf32, #tpu.memory_space<vmem>>, vector<8x32xf32>,
    } else {
    }
    %c3_i32 = arith.constant 3 : i32
    %51 = arith.cmpi eq, %arg2, %c3_i32 : i32
    %52 = arith.extui %51 : i1 to i32
    %c0_i32_40 = arith.constant 0 : i32
    %53 = arith.cmpi ne, %52, %c0_i32_40 : i32
    scf.if %53 {
      %c0_41 = arith.constant 0 : index
      %c0_42 = arith.constant 0 : index
      %54 = vector.load %arg14[%c0_41, %c0_42] : memref<8x32xf32, #tpu.memory_space<vmem>>, vector<8x32xf32>
      %c0_43 = arith.constant 0 : index
      %c0_44 = arith.constant 0 : index
      %55 = vector.load %arg12[%c0_43, %c0_44] : memref<1x32xf32, #tpu.memory_space<vmem>>, vector<1x32xf32>
      %56 = vector.broadcast %55 : vector<1x32xf32> to vector<8x32xf32>
      %57 = arith.addf %54, %56 : vector<8x32xf32>
      %c0_45 = arith.constant 0 : index
      %c0_46 = arith.constant 0 : index
      %c0_47 = arith.constant 0 : index
      %58 = vector.load %arg13[%c0_45, %c0_46, %c0_47] : memref<1x8x32xf32, #tpu.memory_space<vmem>>, vector<1x8x32xf32>
      %59 = vector.shape_cast %58 : vector<1x8x32xf32> to vector<8x32xf32>
      %60 = vector.shape_cast %57 : vector<8x32xf32> to vector<1x8x32xf32>
      tpu.vector_store %arg13[%c0_45, %c0_46, %c0_47], %60 {strides = array<i32>} : memref<1x8x32xf32, #tpu.memory_space<vmem>>, vector<1x8x32xf32>,
    } else {
    }
    return
  }
  func.func @transform_0(%arg0: i32, %arg1: i32, %arg2: i32) -> (i32, i32, i32) {
    %c0_i32 = arith.constant 0 : i32
    %c0_i32_0 = arith.constant 0 : i32
    return %arg0, %arg1, %c0_i32 : i32, i32, i32
  }
  func.func @transform_1(%arg0: i32, %arg1: i32, %arg2: i32) -> (i32, i32, i32, i32) {
    %c0_i32 = arith.constant 0 : i32
    %c0_i32_0 = arith.constant 0 : i32
    %c0_i32_1 = arith.constant 0 : i32
    return %arg0, %arg2, %c0_i32, %c0_i32_0 : i32, i32, i32, i32
  }
  func.func @transform_2(%arg0: i32, %arg1: i32, %arg2: i32) -> (i32, i32, i32, i32) {
    %c0_i32 = arith.constant 0 : i32
    %c0_i32_0 = arith.constant 0 : i32
    %c0_i32_1 = arith.constant 0 : i32
    return %arg0, %arg2, %c0_i32, %c0_i32_0 : i32, i32, i32, i32
  }
  func.func @transform_3(%arg0: i32, %arg1: i32, %arg2: i32) -> (i32, i32, i32, i32) {
    %c0_i32 = arith.constant 0 : i32
    %c0_i32_0 = arith.constant 0 : i32
    return %arg0, %arg2, %arg1, %c0_i32 : i32, i32, i32, i32
  }
  func.func @transform_4(%arg0: i32, %arg1: i32, %arg2: i32) -> (i32, i32, i32) {
    %c0_i32 = arith.constant 0 : i32
    %c0_i32_0 = arith.constant 0 : i32
    %c0_i32_1 = arith.constant 0 : i32
    return %arg0, %c0_i32, %c0_i32_0 : i32, i32, i32
  }
  func.func @transform_5(%arg0: i32, %arg1: i32, %arg2: i32) -> (i32, i32, i32) {
    %c0_i32 = arith.constant 0 : i32
    %c0_i32_0 = arith.constant 0 : i32
    %c0_i32_1 = arith.constant 0 : i32
    return %arg2, %c0_i32, %c0_i32_0 : i32, i32, i32
  }
  func.func @transform_6(%arg0: i32, %arg1: i32, %arg2: i32) -> (i32, i32, i32) {
    %c0_i32 = arith.constant 0 : i32
    %c0_i32_0 = arith.constant 0 : i32
    %c0_i32_1 = arith.constant 0 : i32
    return %arg2, %c0_i32, %c0_i32_0 : i32, i32, i32
  }
  func.func @transform_7(%arg0: i32, %arg1: i32, %arg2: i32) -> (i32, i32, i32) {
    %c0_i32 = arith.constant 0 : i32
    %c0_i32_0 = arith.constant 0 : i32
    %c0_i32_1 = arith.constant 0 : i32
    return %arg2, %c0_i32, %c0_i32_0 : i32, i32, i32
  }
  func.func @transform_8(%arg0: i32, %arg1: i32, %arg2: i32) -> (i32, i32, i32) {
    %c0_i32 = arith.constant 0 : i32
    %c0_i32_0 = arith.constant 0 : i32
    %c0_i32_1 = arith.constant 0 : i32
    return %arg2, %c0_i32, %c0_i32_0 : i32, i32, i32
  }
  func.func @transform_9(%arg0: i32, %arg1: i32, %arg2: i32) -> (i32, i32) {
    %c0_i32 = arith.constant 0 : i32
    %c0_i32_0 = arith.constant 0 : i32
    %c0_i32_1 = arith.constant 0 : i32
    return %c0_i32, %c0_i32_0 : i32, i32
  }
  func.func @transform_10(%arg0: i32, %arg1: i32, %arg2: i32) -> (i32, i32, i32) {
    %c0_i32 = arith.constant 0 : i32
    %c0_i32_0 = arith.constant 0 : i32
    return %arg0, %arg1, %c0_i32 : i32, i32, i32
  }
}

</mosaic_0001>

<bundles_post_ra>
// kernel: tpu_custom_call.1
= control target key start
LH: loop header
LB: loop body
LE: loop exit
PB: predicated region body
PF: predicated region fallthrough
CT: control target
= control target key end

     0   :  { %s1761_s0 = inlined_call_operand.vmem [shape: f32[2,8,32], index: 0, kind: input, shape index: {}]   ;;  %s1762_s1 = inlined_call_operand.vmem [shape: f32[2,4,8,8], index: 1, kind: input, shape index: {}]   ;;  %s1763_s2 = inlined_call_operand.vmem [shape: f32[2,4,8,8], index: 2, kind: input, shape index: {}]   ;;  %s1764_s3 = inlined_call_operand.vmem [shape: f32[2,4,8,8], index: 3, kind: input, shape index: {}]   ;;  %s1765_s4 = inlined_call_operand.vmem [shape: f32[2,1,8], index: 4, kind: input, shape index: {}]   ;;  %s1766_s5 = inlined_call_operand.vmem [shape: f32[4,32,8], index: 5, kind: input, shape index: {}]   ;;  %s1767_s6 = inlined_call_operand.vmem [shape: f32[4,32,8], index: 6, kind: input, shape index: {}]   ;;  %s1768_s7 = inlined_call_operand.vmem [shape: f32[4,1,8], index: 7, kind: input, shape index: {}]   ;;  %s1769_s8 = inlined_call_operand.vmem [shape: f32[4,8,32], index: 8, kind: input, shape index: {}]   ;;  %s1770_s9 = inlined_call_operand.vmem [shape: f32[1,32], index: 9, kind: input, shape index: {}]   ;;  %s1771_s10 = inlined_call_operand.hbm [shape: f32[2,8,32], index: 10, kind: output, shape index: {}]  }
   0x1   :  { %1777 = sst [smem:[#allocation11_spill]] %s1766_s5 }
   0x2   :  { %15 = vsyncpa [#allocation4], 0 }
   0x3   :  { %17 = vsyncpa [#allocation4 + $0x1], 0  ;;  %s1554_s13 = smov 0   ;;  %s1556_s14 = smov 0  }
   0x4   :  { %s1558_s15 = smov 0   ;;  %s1560_s16 = smov 0  }
   0x5   :  { %s1562_s17 = smov 0   ;;  %s1564_s18 = smov 0  }
   0x6   :  { %s1566_s19 = smov 0   ;;  %s1568_s20 = smov 0  }
   0x7 LB: > { %1778 = sst [smem:[#allocation6_spill]] %s1485_s18  ;;  %s1216_s21 = sadd.s32 4294967295, %s1493_s20   ;;  %s1493_s20 = sphi %s1568_s20, %s23_s20   ;;  %s1489_s19 = sphi %s1566_s19, %s1792_s19   ;;  %s1485_s18 = sphi %s1564_s18, %s1791_s18   ;;  %s1481_s17 = sphi %s1562_s17, %s1790_s17   ;;  %s1477_s16 = sphi %s1560_s16, %s1789_s16   ;;  %s1473_s15 = sphi %s1558_s15, %s1795_s15   ;;  %s1469_s14 = sphi %s1556_s14, %s1794_s14   ;;  %s1465_s13 = sphi %s1554_s13, %s1793_s13  }
   0x8   : > { %1779 = sst [smem:[#allocation7_spill]] %s1489_s19  ;;  %s1217_s22 = sadd.s32 4294967294, %s1493_s20  }
   0x9   : > { %s35_s23 = sadd.s32 1, %s1485_s18  ;;  %s42_s24 = sadd.s32 1, %s1489_s19 }
   0xa   : > { %p36_p0 = scmp.ge.s32.totalorder %s35_s23, 4  ;;  %p326_p1 = scmp.ne.s32.totalorder %s1473_s15, %s1469_s14 }
   0xb   : > { %p327_p2 = scmp.eq.s32.totalorder %s1216_s21, 7  ;;  %p332_p4 = scmp.ne.s32.totalorder %s1469_s14, %s1465_s13 }
   0xc   : > { %s1797_s23 = smov (%p36_p0, %s35_s23), 0  ;;  %s1799_s24 = smov (!%p36_p0, %s42_s24), %s1489_s19 }
   0xd   : > { %1780 = sst [smem:[#allocation8_spill]] %s1797_s23  ;;  %p1603_p3 = por %p327_p2, %p326_p1 }
   0xe   : > { %p44_p5 = scmp.ge.s32.totalorder %s1799_s24, 2  ;;  %p333_p6 = scmp.eq.s32.totalorder %s1217_s22, 7 }
   0xf   : > { %p1220_p7 = scmp.ge.s32.totalorder %s1493_s20, 1  ;;  %p435_p8 = scmp.lt.s32.totalorder %s1493_s20, 9 }
  0x10   : > { %s1801_s24 = smov (%p44_p5, %s1799_s24), 0  ;;  %p1613_p9 = por %p333_p6, %p332_p4 }
  0x11   : > { %1782 = sst [smem:[#allocation9_spill]] %s1801_s24  ;;  %p436_p10 = pnand %p1220_p7, %p435_p8 }
  0x12   : > { %s311_s27 = ssub.s32 %s1489_s19, %s1801_s24  ;;  %s316_s28 = sadd.s32 1, %s1473_s15  ;;  %v1495_v0 = vmov (!%p436_p10), 0.0|0.0   ;;  %vm1496_vm0 = vmmov (!%p436_p10), 0   ;;  %v1497_v1 = vmov (!%p436_p10), 0.0   ;;  %vm583_vm1 = vcmask (!%p436_p10), 261120  }
  0x13   : > { %p314_p11 = scmp.eq.s32.totalorder %s311_s27, 0  ;;  %439 = sbr.rel (%p436_p10) target bundleno = 1134 (0x46e), region = 60  ;;  %1305 = vmatprep.subr.bf16.mxu0 (!%p436_p10), %v1495_v0  ;;  %1276 = vmatprep.mubr.msk.f32.mxu0 (!%p436_p10), %vm1496_vm0, %v1497_v1  ;;  %vm658_vm2 = vcmask (!%p436_p10), 64512  }
  0x14   : > { %s1772_s30 = sand.u32 (!%p436_p10), 1, %s1469_s14   ;;  %p531_p12 = scmp.lt.s32.totalorder (!%p436_p10), %s1477_s16, 3  ;;  %1279 = vmatprep.subr.mxu1 (!%p436_p10), %v1497_v1  ;;  %1281 = vmatprep.mubr.msk.f32.mxu1 (!%p436_p10), %vm1496_vm0, %v1497_v1 }
  0x15   : > { %s1621_s29 = scalar_select %p314_p11, %s1473_s15, %s316_s28  }
  0x16   : > { %s1627_s11 = sshll.u32 (!%p436_p10), %s1772_s30, 3  ;;  %p522_p13 = scmp.lt.s32.totalorder (!%p436_p10), %s1481_s17, 1 }
  0x17   : > { %1784 = sst [smem:[#allocation10_spill]] %s1621_s29  ;;  %s1785_s5 = sld [smem:[#allocation11_spill]] (!%p436_p10) }
  0x18   : > { %p1242_p0 = scmp.ne.s32.totalorder (!%p436_p10), %s1477_s16, 0 }
  0x1a   : > { %s1637_s12 = scalar_select %p531_p12, %s1477_s16, 3 }
  0x1b   : > { %s1640_s21 = scalar_select %p522_p13, %s1481_s17, 1 }
  0x1c   : > { %s1776_s22 = sshll.u32 %s1637_s12, 5 }
  0x1d   : > { %s563_s30 = scalar_lea.vmem %s1785_s5, %s1776_s22  ;;  %s1222_s24 = sshll.u32 %s1640_s21, 3 }
  0x1e   : > { %v579_v2 = vld [vmem:[%s563_s30] sm:$0xff]  ;;  %v580_v3 = vld [vmem:[%s563_s30 + $0x8] sm:$0xff]  ;;  %v581_v4 = vld [vmem:[%s563_s30 + $0x10] sm:$0xff]  ;;  %s528_s18 = scalar_lea.vmem %s1761_s0, %s1222_s24  ;;  %s558_s5 = scalar_lea.vmem %s1765_s4, %s1640_s21 }
  0x1f   : > { %v1306_v5 = vpack.c.bf16 %v580_v3, %v579_v2  ;;  %v582_v6 = vld [vmem:[%s563_s30 + $0x18] sm:$0xff]  ;;  %v576_v8 = vld [vmem:[%s528_s18] sm:$0xff]  ;;  %s1223_s30 = sshll.u32 %s1640_s21, 2  ;;  %s1786_s21 = sshll.u32 %s1637_s12, 5 }
  0x20   : > { %v1309_v7 = vpack.c.bf16 %v582_v6, %v581_v4  ;;  %s534_s27 = sadd.s32 %s1223_s30, %s1637_s12  ;;  %v1236_v14 = vld [vmem:[%s558_s5] ss:$0 sm:$0xff] }
  0x21   : > { %1307 = vmatpush3.bf16.msra.mxu0 %v1306_v5  ;;  %s1224_s28 = sshll.u32 %s534_s27, 3 }
  0x22   : > { %1308 = vmatprep.subr.bf16.mxu0 %v1495_v0  ;;  %s536_s29 = scalar_lea.vmem %s1762_s1, %s1224_s28  ;;  %s555_s23 = scalar_lea.vmem %s1764_s3, %s1224_s28 }
  0x23   : > { %v577_v9 = vld [vmem:[%s536_s29] sm:$0xff]  ;;  %s544_s27 = scalar_lea.vmem %s1763_s2, %s1224_s28  ;;  %s1233_s28 = sshll.u32 %s1637_s12, 3 }
  0x24   : > { %1280 = vmatpush3.msra.mxu1 %v577_v9  ;;  %v657_v12 = vld [vmem:[%s555_s23] sm:$0xff]  ;;  %s568_s23 = scalar_lea.vmem %s1767_s6, %s1786_s21  ;;  %s575_s5 = scalar_lea.vmem %s1769_s8, %s1233_s28 }
  0x25   : > { %1310 = vmatpush3.bf16.msra.mxu0 %v1309_v7  ;;  %1284 = vmatprep.subr.mxu1 %v1497_v1  ;;  %v578_v19 = vld [vmem:[%s544_s27] sm:$0xff]  ;;  %v826_v24 = vld [vmem:[%s568_s23 + $0x8] sm:$0xff]  ;;  %v827_v26 = vld [vmem:[%s568_s23 + $0x10] sm:$0xff]  ;;  %s571_s27 = scalar_lea.vmem %s1768_s7, %s1637_s12  ;;  %s521_s12 = scalar_lea.vmem [#allocation3], %s1627_s11 }
  0x26   : > { %1300 = vmatprep.subr.mxu0 %v1497_v1  ;;  %v825_v23 = vld [vmem:[%s568_s23] sm:$0xff]  ;;  %v828_v27 = vld [vmem:[%s568_s23 + $0x18] sm:$0xff] }
  0x27   : > { %v1312_v25 = vpack.c.bf16 %v826_v24, %v825_v23  ;;  %v1315_v30 = vpack.c.bf16 %v828_v27, %v827_v26  ;;  %v913_v31 = vld [vmem:[%s575_s5] sm:$0xff] }
  0x28   : > { %1277 = vmatmul.mubr.msk.f32.vlgmr.msra.gmra.mrb[0].mxu0 %vm583_vm1, %v576_v8  ;;  %v1238_v34 = vld [vmem:[%s571_s27] ss:$0 sm:$0xff] }
  0x29   : > { %1302 = vmatprep.mubr.msk.f32.mxu0 %vm1496_vm0, %v1497_v1  ;;  %1301 = vmatpush3.msra.mxu0 %v913_v31 }
  0xfb   : > { %v653_v10 = vpop.f32.mrb[0].mxu0 }
  0xfc   : > { %v1278_v11 = vpop.f32.mrb[1].mxu0  ;;  %1282 = vmatmul.mubr.msk.f32.vlgmr.msra.gmra.mrb[0].mxu1 %vm658_vm2, %v653_v10 }
  0xfd   : > { %1286 = vmatprep.mubr.msk.f32.mxu1 %vm1496_vm0, %v1497_v1  ;;  %1285 = vmatpush3.msra.mxu1 %v578_v19 }
  0xfe   : > { %1311 = vmatprep.subr.bf16.mxu1 %v1495_v0 }
 0x1cf   : > { %v728_v13 = vpop.f32.mrb[0].mxu1 }
 0x1d0   : > { %v729_v15 = vadd.f32 %v728_v13, %v657_v12  ;;  %v1283_v16 = vpop.f32.mrb[1].mxu1 }
 0x1d2   : > { %v739_v17 = vadd.f32 %v1236_v14, %v729_v15 }
 0x1d4   : > { %v740_v18 = vsel %vm658_vm2, %v739_v17, -inf }
 0x1d5   : > { %741 = vmax.xlane.f32.xlu0 %v740_v18 }
 0x262   : > { %v742_v20 = vpop.xlane.xlu0 %741 }
 0x263   : > { %v743_v21 = vsub.f32 %v739_v17, %v742_v20 }
 0x265   : > { %v744_v22 = vmul.f32 1.442695, %v743_v21 }
 0x267   : > { %1391 = vpow2.f32 %v744_v22 }
 0x271   : > { %v1392_v28 = vpop.eup %1391 }
 0x272   : > { %1287 = vmatmul.mubr.msk.f32.vlgmr.msra.gmra.mrb[2].mxu1 %vm658_vm2, %v1392_v28  ;;  %v746_v29 = vsel %vm658_vm2, %v1392_v28, 0.0 }
 0x273   : > { %1313 = vmatpush3.bf16.msra.mxu1 %v1312_v25  ;;  %747 = vadd.xlane.f32.xlu0 %v746_v29 }
 0x274   : > { %1314 = vmatprep.subr.bf16.mxu1 %v1495_v0  ;;  %1297 = vmatprep.mubr.msk.f32.mxu1 %vm1496_vm0, %v1497_v1 }
 0x277   : > { %1316 = vmatpush3.bf16.msra.mxu1 %v1315_v30 }
 0x27a   : > { %1298 = vmatmul.mubr.msk.f32.vlgmr.msra.gmra.mrb[4].mxu1 %vm583_vm1, %v576_v8 }
 0x300   : > { %v748_v39 = vpop.xlane.xlu0 %747 }
 0x345   : > { %v818_v32 = vpop.f32.mrb[2].mxu1 }
 0x346   : > { %v1288_v33 = vpop.f32.mrb[3].mxu1 }
 0x34d   : > { %v902_v35 = vpop.f32.mrb[4].mxu1 }
 0x34e   : > { %v903_v36 = vadd.f32 %v1238_v34, %v902_v35  ;;  %v1299_v37 = vpop.f32.mrb[5].mxu1 }
 0x350   : > { %v1240_v38 = vmul.f32 -1.442695, %v903_v36 }
 0x352   : > { %1393 = vpow2.f32 %v1240_v38 }
 0x353   : > { %1395 = vrcp.f32 %v748_v39 }
 0x35c   : > { %v1394_v40 = vpop.eup %1393 }
 0x35d   : > { %v909_v41 = vadd.f32 1.0, %v1394_v40  ;;  %v1396_v42 = vpop.eup %1395 }
 0x35e   : > { %v824_v43 = vmul.f32 %v1396_v42, %v818_v32 }
 0x35f   : > { %1397 = vrcp.f32 %v909_v41 }
 0x369   : > { %v1398_v44 = vpop.eup %1397 }
 0x36a   : > { %v912_v45 = vmul.f32 %v1398_v44, %v824_v43 }
 0x36c   : > { %1303 = vmatmul.mubr.msk.f32.vlgmr.msra.gmra.mrb[2].mxu0 %vm658_vm2, %v912_v45 }
 0x43a   : > { %990 = sbr.rel (%p1242_p0) target bundleno = 1089 (0x441), region = 64 }
 0x43f   : > { %v983_v46 = vpop.f32.mrb[2].mxu0 }
 0x440   : > { %v1304_v47 = vpop.f32.mrb[3].mxu0  ;;  %991 = vst.msk [vmem:[#allocation2] sm:$0xff] (!%p1242_p0), %vm583_vm1, %v983_v46 }
 0x441 PF: > { %p1243_p1 = scmp.eq.s32.totalorder %s1477_s16, 0 }
 0x443   : > { %995 = sbr.rel (%p1243_p1) target bundleno = 1099 (0x44b), region = 68 }
 0x447   : > { %v996_v48 = vld [vmem:[#allocation2] sm:$0xff] (!%p1243_p1) }
 0x448   : > { %v997_v49 = vadd.f32 (!%p1243_p1), %v996_v48, %v983_v46 }
 0x44a   : > { %998 = vst.msk [vmem:[#allocation2] sm:$0xff] %vm583_vm1, %v997_v49 }
 0x44b PF: > { %p1244_p2 = scmp.ne.s32.totalorder %s1477_s16, 3 }
 0x44c   : > { %v1245_v51 = vld [vmem:[%s1770_s9] ss:$0 sm:$0xff] (!%p1244_p2) }
 0x44d   : > { %1002 = sbr.rel (%p1244_p2) target bundleno = 1109 (0x455), region = 72 }
 0x451   : > { %v1003_v50 = vld [vmem:[#allocation2] sm:$0xff] (!%p1244_p2) }
 0x452   : > { %v1011_v52 = vadd.f32 (!%p1244_p2), %v1245_v51, %v1003_v50 }
 0x454   : > { %1012 = vst.msk [vmem:[%s521_s12] sm:$0xff] %vm583_vm1, %v1011_v52 }
 0x455 PF: > { %s1247_s18 = sshll.u32 %s1481_s17, 7  ;;  %s1028_s16 = sshll.u32 %s521_s12, 4  ;;  %s1029_s16 = int_to_ptr.vmem [resolvable:$true] %s1028_s16 }
 0x456   : > { %s1712_s28 = scalar_lea.hbm %s1771_s10, %s1247_s18  ;;  %s1787_s24 = sand.u32 1, %s1469_s14  }
 0x457   : > { %s1014_s30 = scalar_lea.sflag [#allocation4], %s1787_s24  ;;  %s1399_s5 = scalar_lea.vmem %s1029_s16, 128 }
 0x458   : > { %p1400_p4 = scmp.ne.s32.totalorder %s1029_s16, %s1399_s5  ;;  %s1498_s29 = smov [#allocation3]  }
 0x459   : > { %s1403_s22 = sshll.u32 %s1498_s29, 4  ;;  %s1404_s22 = int_to_ptr.vmem [resolvable:$false] %s1403_s22 }
 0x45a   : > { %p1401_p5 = pnand %p1400_p4, %p1603_p3  ;;  %s1405_s27 = scalar_lea.vmem %s1404_s22, 256 }
 0x45b   : > { %p1406_p7 = scmp.lt.s32.totalorder %s1029_s16, %s1404_s22  ;;  %p1407_p8 = scmp.lt.s32.totalorder %s1405_s27, %s1399_s5 }
 0x45c   : > { %p1402_p6 = pneg %p1401_p5 }
 0x45d   : > { %p1408_p10 = por %p1407_p8, %p1406_p7 }
 0x45f   : > { %p1409_p11 = pnand %p1408_p10, %p1402_p6 }
 0x461   : > { %1412 = shalt.err (!%p1409_p11)
}
 0x462   : > { %s1413_s17 = scalar_lea.hbm %s1712_s28, 128  ;;  %s1417_s11 = scalar_lea.hbm %s1771_s10, 256 }
 0x463   : > { %p1414_p12 = scmp.ne.s32.totalorder %s1712_s28, %s1413_s17  ;;  %p1418_p1 = scmp.lt.u32.totalorder %s1712_s28, %s1771_s10 }
 0x464   : > { %p1419_p2 = scmp.lt.u32.totalorder %s1417_s11, %s1413_s17  ;;  %p1421_p5 = scmp.lt.u32.totalorder %s1413_s17, %s1712_s28 }
 0x465   : > { %p1415_p13 = pnand %p1414_p12, %p1603_p3 }
 0x466   : > { %p1420_p4 = por %p1419_p2, %p1418_p1 }
 0x467   : > { %p1416_p0 = pneg %p1415_p13 }
 0x468   : > { %p1422_p6 = por %p1421_p5, %p1420_p4 }
 0x46a   : > { %p1423_p7 = pnand %p1422_p6, %p1416_p0 }
 0x46c   : > { %1426 = shalt.err (!%p1423_p7)
}
 0x46d   : > { %1317 = dma.vmem_to_hbm [thread:$0]  (%p1603_p3), %s1029_s16, 128, %s1712_s28, %s1014_s30  }
 0x46e PF: > { %p1323_p8 = scmp.ge.s32.totalorder %s1493_s20, 2  ;;  %s1040_s23 = sand.u32 1, %s1465_s13  }
 0x46f   : > { %s1041_s24 = scalar_lea.sflag [#allocation4], %s1040_s23 }
 0x470   : > { %p1320_p10 = pnand %p1323_p8, %p1613_p9 }
 0x472   : > { %1460 = dma.done.wait (!%p1320_p10), %s1041_s24, 128  }
 0x473   : > { %1462 = vsyncadd (!%p1320_p10), %s1041_s24, 4294967168  ;;  %s23_s20 = sadd.s32 1, %s1493_s20   ;;  %s1788_s5 = sld [smem:[#allocation10_spill]] }
 0x474   : > { %p20_p11 = scmp.ge.s32.totalorder %s23_s20, 10   ;;  %s1789_s16 = sld [smem:[#allocation6_spill]] }
 0x475   : > { %s1790_s17 = sld [smem:[#allocation7_spill]]  ;;  %s1791_s18 = sld [smem:[#allocation8_spill]] }
 0x476   : > { %s1792_s19 = sld [smem:[#allocation9_spill]]  ;;  %s1793_s13 = smov %s1469_s14 }
 0x477   : > { %s1794_s14 = smov %s1473_s15  ;;  %22 = sbr.rel (!%p20_p11) target bundleno = 7 (0x7), region = 131 }
 0x479   : > { %s1795_s15 = smov %s1788_s5 }
 0x47e   :  { %1046 = vsyncpa [#allocation4], 1 }
 0x47f   :  { %1048 = vsyncpa [#allocation4 + $0x1], 1 }

</bundles_post_ra>
